<compile_context>
chip_gen: v6e
topology: v6e:2x2x1
jax: 0.10.0
libtpu: 0.0.40
codegen_flags: <defaults>
</compile_context>

<pallas_src>
import functools

import jax
import jax.numpy as jnp
from jax.experimental import pallas as pl
from jax.experimental.pallas import tpu as pltpu


def _apply_act(y, act):
    if act == "relu":
        return jnp.maximum(y, 0.0)
    if act == "sigmoid":
        return jax.nn.sigmoid(y)
    if act == "tanh":
        return jnp.tanh(y)
    if act == "identity":
        return y
    raise ValueError(f"unknown activation {act!r}")


def _round_up(x, m):
    return ((x + m - 1) // m) * m


def _fused_decoder_kernel(*refs, activations):
    # refs = (x_ref, w0_ref, b0_ref, w1_ref, b1_ref, ..., o_ref)
    x_ref = refs[0]
    o_ref = refs[-1]
    wb_refs = refs[1:-1]

    h = x_ref[...]  # (TB, Din) bf16 — already MXU-native, no cast needed
    n_layers = len(activations)
    for i, act in enumerate(activations):
        w = wb_refs[2 * i][...]        # (Din_i, Dout_i) bf16
        b = wb_refs[2 * i + 1][...]    # (1, Dout_i)      f32
        # bf16 x bf16 -> f32 accumulate on the MXU.
        y = jnp.dot(h, w, preferred_element_type=jnp.float32)
        y = y + b                      # f32 bias + activation on the VPU/EUP
        y = _apply_act(y, act)
        # Carry intermediates in bf16 (next matmul consumes bf16 anyway);
        # keep the final layer's f32 value for the output cast.
        h = y.astype(jnp.bfloat16) if i < n_layers - 1 else y
    o_ref[...] = h.astype(o_ref.dtype)


def fused_decoder_forward(x, params, internal_activation, output_activation,
                          out_dtype=None, block_batch=512):
    """Run the whole decoder stack as one fused Pallas TPU kernel.

    params: list of (w, b) with w of shape (din, dout) and b of shape (dout,),
    both stored f32 (cast to MXU-friendly dtypes at the call boundary).
    """
    n = len(params)
    activations = tuple(
        internal_activation if i < n - 1 else output_activation
        for i in range(n)
    )

    B = x.shape[0]
    Din = params[0][0].shape[0]
    Dout_final = params[-1][0].shape[1]

    if out_dtype is None:
        # Bounded outputs tolerate bf16 and halve the writeback stream.
        out_dtype = (jnp.bfloat16 if output_activation in ("sigmoid", "tanh")
                     else jnp.float32)

    # Batch tile: multiple of 16 (bf16 sublane packing); cap so VMEM use per
    # step stays small even for very large B (v7x scoped VMEM is 32 MiB).
    if B >= block_batch:
        TB = block_batch
    else:
        TB = _round_up(max(B, 1), 16)
    B_pad = _round_up(B, TB)
    grid = (B_pad // TB,)

    x_in = x.astype(jnp.bfloat16)
    if B_pad != B:
        x_in = jnp.pad(x_in, ((0, B_pad - B), (0, 0)))

    flat_inputs = [x_in]
    in_specs = [pl.BlockSpec((TB, Din), lambda i: (i, 0),
                             memory_space=pltpu.MemorySpace.VMEM)]
    for w, b in params:
        wb = w.astype(jnp.bfloat16)
        bb = b.reshape(1, -1).astype(jnp.float32)
        flat_inputs.append(wb)
        flat_inputs.append(bb)
        # Whole-array, grid-invariant blocks: fetched once, stay VMEM-resident.
        in_specs.append(pl.BlockSpec(wb.shape, lambda i: (0, 0),
                                     memory_space=pltpu.MemorySpace.VMEM))
        in_specs.append(pl.BlockSpec(bb.shape, lambda i: (0, 0),
                                     memory_space=pltpu.MemorySpace.VMEM))

    out_specs = pl.BlockSpec((TB, Dout_final), lambda i: (i, 0),
                             memory_space=pltpu.MemorySpace.VMEM)

    flops = sum(2 * B_pad * w.shape[0] * w.shape[1] for w, _ in params)
    transc = sum(
        B_pad * w.shape[1]
        for (w, _), act in zip(params, activations)
        if act in ("sigmoid", "tanh")
    )
    bytes_accessed = (
        sum(int(a.size) * a.dtype.itemsize for a in flat_inputs)
        + B_pad * Dout_final * jnp.dtype(out_dtype).itemsize
    )

    kernel = functools.partial(_fused_decoder_kernel, activations=activations)

    out = pl.pallas_call(
        kernel,
        out_shape=jax.ShapeDtypeStruct((B_pad, Dout_final), out_dtype),
        grid=grid,
        in_specs=in_specs,
        out_specs=out_specs,
        compiler_params=pltpu.CompilerParams(
            # v7x: split the batch axis across both TensorCores; harmless on
            # single-TC v5e/v6e.
            dimension_semantics=("parallel",),
        ),
        cost_estimate=pl.CostEstimate(
            flops=flops,
            transcendentals=transc,
            bytes_accessed=bytes_accessed,
        ),
    )(*flat_inputs)

    if B_pad != B:
        out = out[:B]
    return out


class Decoder:
    """JAX/Pallas port of the PyTorch Decoder (stack of Linear + activation)."""

    def __init__(self, layers_dim, internal_activation, output_activation, key):
        self.layers_dim = list(layers_dim)
        self.internal_activation = internal_activation
        self.output_activation = output_activation
        self.params = []
        n_layers = len(layers_dim) - 1
        keys = jax.random.split(key, n_layers)
        for i in range(1, len(layers_dim)):
            din, dout = layers_dim[i - 1], layers_dim[i]
            kw, kb = jax.random.split(keys[i - 1])
            # PyTorch nn.Linear default init: U(-1/sqrt(fan_in), 1/sqrt(fan_in)).
            bound = 1.0 / (din ** 0.5)
            # Stored already transposed to (din, dout); kept in f32 for
            # fidelity to the PyTorch module (cast to bf16 at the kernel
            # boundary only).
            w = jax.random.uniform(kw, (din, dout), jnp.float32, -bound, bound)
            bvec = jax.random.uniform(kb, (dout,), jnp.float32, -bound, bound)
            self.params.append((w, bvec))

    def __call__(self, x):
        return fused_decoder_forward(
            x, self.params, self.internal_activation, self.output_activation
        )


def _reference_forward(x, params, internal_activation, output_activation,
                       matmul_dtype):
    """Pure-JAX reference.  matmul_dtype=bf16 replicates the kernel numerics;
    matmul_dtype=f32 is the full-precision (PyTorch-fidelity) reference."""
    n = len(params)
    h = x.astype(jnp.float32)
    for i, (w, bvec) in enumerate(params):
        act = internal_activation if i < n - 1 else output_activation
        y = jnp.dot(h.astype(matmul_dtype), w.astype(matmul_dtype),
                    preferred_element_type=jnp.float32)
        y = y + bvec.astype(jnp.float32)
        y = _apply_act(y, act)
        h = y.astype(matmul_dtype).astype(jnp.float32) \
            if (matmul_dtype == jnp.bfloat16 and i < n - 1) else y
    return h


if __name__ == "__main__":
    key = jax.random.PRNGKey(0)
    k_x, k_params = jax.random.split(key)

    # Small shapes consistent with the module: latent 32 -> 64 -> 128 -> 256.
    layers_dim = [32, 64, 128, 256]
    decoder = Decoder(
        layers_dim,
        internal_activation="relu",
        output_activation="sigmoid",
        key=k_params,
    )

    # --- small batch (single grid step, exercises B-padding) ---
    batch = 8
    x_small = jax.random.normal(k_x, (batch, layers_dim[0]), jnp.float32)
    out_small = jax.block_until_ready(decoder(x_small))
    assert out_small.shape == (batch, layers_dim[-1])

    # --- larger batch (multiple grid steps, weights stay VMEM-resident) ---
    batch_big = 1024
    x_big = jax.random.normal(k_x, (batch_big, layers_dim[0]), jnp.float32)
    out_big = jax.block_until_ready(
        fused_decoder_forward(
            x_big, decoder.params,
            decoder.internal_activation, decoder.output_activation,
            block_batch=256,
        )
    )
    assert out_big.shape == (batch_big, layers_dim[-1])

    for x_t, out_t in ((x_small, out_small), (x_big, out_big)):
        out_f32 = out_t.astype(jnp.float32)
        # Same-numerics reference (bf16 matmul inputs, f32 accumulate/act).
        ref_bf16 = _reference_forward(
            x_t, decoder.params, decoder.internal_activation,
            decoder.output_activation, matmul_dtype=jnp.bfloat16)
        assert jnp.allclose(out_f32, ref_bf16, atol=5e-3, rtol=5e-3), (
            float(jnp.max(jnp.abs(out_f32 - ref_bf16))))
        # Full-f32 reference (fidelity to the PyTorch module) — bf16-level
        # tolerance on sigmoid outputs in [0, 1].
        ref_f32 = _reference_forward(
            x_t, decoder.params, decoder.internal_activation,
            decoder.output_activation, matmul_dtype=jnp.float32)
        assert jnp.allclose(out_f32, ref_f32, atol=3e-2, rtol=3e-2), (
            float(jnp.max(jnp.abs(out_f32 - ref_f32))))

    print("KERNEL_OK")
</pallas_src>

<mosaic_0001>
module attributes {stable_mosaic.version = 11 : i64} {
  func.func @_fused_decoder_kernel(%arg0: i32, %arg1: memref<16x32xbf16, #tpu.memory_space<vmem>>, %arg2: memref<32x64xbf16, #tpu.memory_space<vmem>>, %arg3: memref<1x64xf32, #tpu.memory_space<vmem>>, %arg4: memref<64x128xbf16, #tpu.memory_space<vmem>>, %arg5: memref<1x128xf32, #tpu.memory_space<vmem>>, %arg6: memref<128x256xbf16, #tpu.memory_space<vmem>>, %arg7: memref<1x256xf32, #tpu.memory_space<vmem>>, %arg8: memref<16x256xbf16, #tpu.memory_space<vmem>>) attributes {dimension_semantics = [#tpu.dimension_semantics<parallel>], iteration_bounds = array<i64: 1>, scalar_prefetch = 0 : i64, scratch_operands = 0 : i64, tpu.core_type = #tpu.core_type<tc>, window_params = [{transform_indices = @transform_0, window_bounds = array<i64: 16, 32>}, {pipeline_mode = #tpu.pipeline_mode<synchronous>, transform_indices = @transform_1, window_bounds = array<i64: 32, 64>}, {pipeline_mode = #tpu.pipeline_mode<synchronous>, transform_indices = @transform_2, window_bounds = array<i64: 1, 64>}, {pipeline_mode = #tpu.pipeline_mode<synchronous>, transform_indices = @transform_3, window_bounds = array<i64: 64, 128>}, {pipeline_mode = #tpu.pipeline_mode<synchronous>, transform_indices = @transform_4, window_bounds = array<i64: 1, 128>}, {pipeline_mode = #tpu.pipeline_mode<synchronous>, transform_indices = @transform_5, window_bounds = array<i64: 128, 256>}, {pipeline_mode = #tpu.pipeline_mode<synchronous>, transform_indices = @transform_6, window_bounds = array<i64: 1, 256>}, {transform_indices = @transform_7, window_bounds = array<i64: 16, 256>}]} {
    %c0 = arith.constant 0 : index
    %c0_0 = arith.constant 0 : index
    %0 = vector.load %arg1[%c0, %c0_0] : memref<16x32xbf16, #tpu.memory_space<vmem>>, vector<16x32xbf16>
    %c0_1 = arith.constant 0 : index
    %c0_2 = arith.constant 0 : index
    %1 = vector.load %arg2[%c0_1, %c0_2] : memref<32x64xbf16, #tpu.memory_space<vmem>>, vector<32x64xbf16>
    %c0_3 = arith.constant 0 : index
    %c0_4 = arith.constant 0 : index
    %2 = vector.load %arg3[%c0_3, %c0_4] : memref<1x64xf32, #tpu.memory_space<vmem>>, vector<1x64xf32>
    %cst = arith.constant dense<0.000000e+00> : vector<16x64xf32>
    %3 = tpu.matmul %0, %1, %cst {dimension_numbers = #tpu.dot_dimension_numbers<[1], [0], [0], [1], [0, 0, 1, 1], [], []>} : vector<16x32xbf16>, vector<32x64xbf16>, vector<16x64xf32> -> vector<16x64xf32>
    %4 = vector.broadcast %2 : vector<1x64xf32> to vector<16x64xf32>
    %5 = arith.addf %3, %4 : vector<16x64xf32>
    %cst_5 = arith.constant 0.000000e+00 : f32
    %6 = vector.broadcast %cst_5 : f32 to vector<16x64xf32>
    %7 = arith.maximumf %5, %6 : vector<16x64xf32>
    %8 = arith.truncf %7 : vector<16x64xf32> to vector<16x64xbf16>
    %c0_6 = arith.constant 0 : index
    %c0_7 = arith.constant 0 : index
    %9 = vector.load %arg4[%c0_6, %c0_7] : memref<64x128xbf16, #tpu.memory_space<vmem>>, vector<64x128xbf16>
    %c0_8 = arith.constant 0 : index
    %c0_9 = arith.constant 0 : index
    %10 = vector.load %arg5[%c0_8, %c0_9] : memref<1x128xf32, #tpu.memory_space<vmem>>, vector<1x128xf32>
    %cst_10 = arith.constant dense<0.000000e+00> : vector<16x128xf32>
    %11 = tpu.matmul %8, %9, %cst_10 {dimension_numbers = #tpu.dot_dimension_numbers<[1], [0], [0], [1], [0, 0, 1, 1], [], []>} : vector<16x64xbf16>, vector<64x128xbf16>, vector<16x128xf32> -> vector<16x128xf32>
    %12 = vector.broadcast %10 : vector<1x128xf32> to vector<16x128xf32>
    %13 = arith.addf %11, %12 : vector<16x128xf32>
    %cst_11 = arith.constant 0.000000e+00 : f32
    %14 = vector.broadcast %cst_11 : f32 to vector<16x128xf32>
    %15 = arith.maximumf %13, %14 : vector<16x128xf32>
    %16 = arith.truncf %15 : vector<16x128xf32> to vector<16x128xbf16>
    %c0_12 = arith.constant 0 : index
    %c0_13 = arith.constant 0 : index
    %17 = vector.load %arg6[%c0_12, %c0_13] : memref<128x256xbf16, #tpu.memory_space<vmem>>, vector<128x256xbf16>
    %c0_14 = arith.constant 0 : index
    %c0_15 = arith.constant 0 : index
    %18 = vector.load %arg7[%c0_14, %c0_15] : memref<1x256xf32, #tpu.memory_space<vmem>>, vector<1x256xf32>
    %cst_16 = arith.constant dense<0.000000e+00> : vector<16x256xf32>
    %19 = tpu.matmul %16, %17, %cst_16 {dimension_numbers = #tpu.dot_dimension_numbers<[1], [0], [0], [1], [0, 0, 1, 1], [], []>} : vector<16x128xbf16>, vector<128x256xbf16>, vector<16x256xf32> -> vector<16x256xf32>
    %20 = vector.broadcast %18 : vector<1x256xf32> to vector<16x256xf32>
    %21 = arith.addf %19, %20 : vector<16x256xf32>
    %22 = arith.negf %21 : vector<16x256xf32>
    %23 = math.exp %22 : vector<16x256xf32>
    %cst_17 = arith.constant 1.000000e+00 : f32
    %24 = vector.broadcast %cst_17 : f32 to vector<16x256xf32>
    %25 = arith.addf %24, %23 : vector<16x256xf32>
    %26 = arith.divf %24, %25 : vector<16x256xf32>
    %27 = arith.truncf %26 : vector<16x256xf32> to vector<16x256xbf16>
    %c0_18 = arith.constant 0 : index
    %c0_19 = arith.constant 0 : index
    %28 = vector.load %arg8[%c0_18, %c0_19] : memref<16x256xbf16, #tpu.memory_space<vmem>>, vector<16x256xbf16>
    tpu.vector_store %arg8[%c0_18, %c0_19], %27 {strides = array<i32>} : memref<16x256xbf16, #tpu.memory_space<vmem>>, vector<16x256xbf16>,
    return
  }
  func.func @transform_0(%arg0: i32) -> (i32, i32) {
    %c0_i32 = arith.constant 0 : i32
    %c0_i32_0 = arith.constant 0 : i32
    return %arg0, %c0_i32 : i32, i32
  }
  func.func @transform_1(%arg0: i32) -> (i32, i32) {
    %c0_i32 = arith.constant 0 : i32
    %c0_i32_0 = arith.constant 0 : i32
    %c0_i32_1 = arith.constant 0 : i32
    return %c0_i32, %c0_i32_0 : i32, i32
  }
  func.func @transform_2(%arg0: i32) -> (i32, i32) {
    %c0_i32 = arith.constant 0 : i32
    %c0_i32_0 = arith.constant 0 : i32
    %c0_i32_1 = arith.constant 0 : i32
    return %c0_i32, %c0_i32_0 : i32, i32
  }
  func.func @transform_3(%arg0: i32) -> (i32, i32) {
    %c0_i32 = arith.constant 0 : i32
    %c0_i32_0 = arith.constant 0 : i32
    %c0_i32_1 = arith.constant 0 : i32
    return %c0_i32, %c0_i32_0 : i32, i32
  }
  func.func @transform_4(%arg0: i32) -> (i32, i32) {
    %c0_i32 = arith.constant 0 : i32
    %c0_i32_0 = arith.constant 0 : i32
    %c0_i32_1 = arith.constant 0 : i32
    return %c0_i32, %c0_i32_0 : i32, i32
  }
  func.func @transform_5(%arg0: i32) -> (i32, i32) {
    %c0_i32 = arith.constant 0 : i32
    %c0_i32_0 = arith.constant 0 : i32
    %c0_i32_1 = arith.constant 0 : i32
    return %c0_i32, %c0_i32_0 : i32, i32
  }
  func.func @transform_6(%arg0: i32) -> (i32, i32) {
    %c0_i32 = arith.constant 0 : i32
    %c0_i32_0 = arith.constant 0 : i32
    %c0_i32_1 = arith.constant 0 : i32
    return %c0_i32, %c0_i32_0 : i32, i32
  }
  func.func @transform_7(%arg0: i32) -> (i32, i32) {
    %c0_i32 = arith.constant 0 : i32
    %c0_i32_0 = arith.constant 0 : i32
    return %arg0, %c0_i32 : i32, i32
  }
}

</mosaic_0001>

<bundles_post_ra>
// kernel: tpu_custom_call.1
= control target key start
LH: loop header
LB: loop body
LE: loop exit
PB: predicated region body
PF: predicated region fallthrough
CT: control target
= control target key end

     0   :  { %12 = vsyncpa [#allocation3], 0  ;;  %s768_s0 = inlined_call_operand.hbm [shape: bf16[16,32], index: 0, kind: input, shape index: {}]   ;;  %s769_s1 = inlined_call_operand.hbm [shape: bf16[32,64], index: 1, kind: input, shape index: {}]   ;;  %s770_s2 = inlined_call_operand.vmem [shape: f32[1,64], index: 2, kind: input, shape index: {}]   ;;  %s771_s3 = inlined_call_operand.hbm [shape: bf16[64,128], index: 3, kind: input, shape index: {}]   ;;  %s772_s4 = inlined_call_operand.vmem [shape: f32[1,128], index: 4, kind: input, shape index: {}]   ;;  %s773_s5 = inlined_call_operand.hbm [shape: bf16[128,256], index: 5, kind: input, shape index: {}]   ;;  %s774_s6 = inlined_call_operand.vmem [shape: f32[1,256], index: 6, kind: input, shape index: {}]   ;;  %s775_s7 = inlined_call_operand.hbm [shape: bf16[16,256], index: 7, kind: output, shape index: {}]  }
   0x1   :  { %13 = vsyncpa [#allocation6], 0 }
   0x2   :  { %14 = vsyncpa [#allocation9], 0 }
   0x3   :  { %15 = vsyncpa [#allocation4], 0  ;;  %s686_s24 = smov [#allocation5]   ;;  %s687_s26 = smov [#allocation2]  }
   0x4   :  { %s33_s25 = sshll.u32 %s686_s24, 4  ;;  %s21_s27 = sshll.u32 %s687_s26, 4  ;;  %s34_s25 = int_to_ptr.vmem [resolvable:$true] %s33_s25  ;;  %s22_s27 = int_to_ptr.vmem [resolvable:$true] %s21_s27 }
   0x5   :  { %s586_s28 = scalar_lea.vmem %s34_s25, 256  ;;  %p591_p1 = scmp.lt.s32.totalorder %s34_s25, %s34_s25 }
   0x6   :  { %p587_p0 = scmp.ne.s32.totalorder %s34_s25, %s586_s28  ;;  %p592_p2 = scmp.lt.s32.totalorder %s586_s28, %s586_s28 }
   0x8   :  { %p593_p3 = por %p592_p2, %p591_p1 }
   0xa   :  { %p594_p4 = pnand %p593_p3, %p587_p0 }
   0xc   :  { %597 = shalt.err (!%p594_p4)
}
   0xd   :  { %s688_s29 = smov 64   ;;  %s689_s30 = smov 4  }
   0xe   :  { %39 = dma.hbm_to_vmem [thread:$0]  %s769_s1, 256, %s34_s25, [#allocation6], %s688_s29, %s688_s29, %s689_s30  }
   0xf   :  { %s606_s10 = scalar_lea.vmem %s22_s27, 128  ;;  %p611_p6 = scmp.lt.s32.totalorder %s22_s27, %s22_s27 }
  0x10   :  { %p607_p5 = scmp.ne.s32.totalorder %s22_s27, %s606_s10  ;;  %p612_p7 = scmp.lt.s32.totalorder %s606_s10, %s606_s10 }
  0x12   :  { %p613_p8 = por %p612_p7, %p611_p6 }
  0x14   :  { %p614_p9 = pnand %p613_p8, %p607_p5 }
  0x16   :  { %617 = shalt.err (!%p614_p9)
}
  0x17   :  { %27 = dma.hbm_to_vmem [thread:$0]  %s768_s0, 128, %s22_s27, [#allocation3], %s688_s29, %s688_s29, %s689_s30  }
  0x18   :  { %s690_s13 = smov [#allocation7]   ;;  %s691_s15 = smov [#allocation8]  }
  0x19   :  { %s47_s14 = sshll.u32 %s690_s13, 4  ;;  %s61_s16 = sshll.u32 %s691_s15, 4  ;;  %s48_s14 = int_to_ptr.vmem [resolvable:$true] %s47_s14  ;;  %s62_s16 = int_to_ptr.vmem [resolvable:$true] %s61_s16 }
  0x1a   :  { %s626_s17 = scalar_lea.vmem %s48_s14, 512  ;;  %p631_p11 = scmp.lt.s32.totalorder %s48_s14, %s48_s14 }
  0x1b   :  { %p627_p10 = scmp.ne.s32.totalorder %s48_s14, %s626_s17  ;;  %p632_p12 = scmp.lt.s32.totalorder %s626_s17, %s626_s17 }
  0x1d   :  { %p633_p13 = por %p632_p12, %p631_p11 }
  0x1f   :  { %p634_p0 = pnand %p633_p13, %p627_p10 }
  0x21   :  { %637 = shalt.err (!%p634_p0)
}
  0x22   :  { %53 = dma.hbm_to_vmem [thread:$0]  %s771_s3, 512, %s48_s14, [#allocation6], %s688_s29, %s688_s29, %s689_s30  }
  0x23   :  { %s646_s19 = scalar_lea.vmem %s62_s16, 2048  ;;  %p651_p2 = scmp.lt.s32.totalorder %s62_s16, %s62_s16 }
  0x24   :  { %p647_p1 = scmp.ne.s32.totalorder %s62_s16, %s646_s19  ;;  %p652_p3 = scmp.lt.s32.totalorder %s646_s19, %s646_s19 }
  0x26   :  { %p653_p4 = por %p652_p3, %p651_p2 }
  0x28   :  { %p654_p5 = pnand %p653_p4, %p647_p1 }
  0x2a   :  { %657 = shalt.err (!%p654_p5)
}
  0x2b   :  { %s692_s0 = smov 128   ;;  %s693_s20 = smov 8  }
  0x2c   :  { %67 = dma.hbm_to_vmem [thread:$0]  %s773_s5, 2048, %s62_s16, [#allocation9], %s692_s0, %s692_s0, %s693_s20  }
  0x2d   :  { %678 = dma.done.wait [#allocation3], 128  }
  0x2e   :  { %679 = vsyncadd [#allocation3], 4294967168 }
  0x2f   :  { %680 = dma.done.wait [#allocation6], 768  }
  0x30   :  { %681 = vsyncadd [#allocation6], 4294966528 }
  0x31   :  { %682 = dma.done.wait [#allocation9], 2048  }
  0x32   :  { %683 = vsyncadd [#allocation9], 4294965248  ;;  %v694_v0 = vmov 0.0   ;;  %vm695_vm0 = vmmov 0   ;;  %v531_v1 = vld [vmem:[#allocation5 + $0x8] sm:$0xff]   ;;  %v532_v2 = vld [vmem:[#allocation5] sm:$0xff]   ;;  %v266_v45 = vlaneseq }
  0x33   :  { %499 = vmatprep.subr.bf16.mxu1 %v694_v0  ;;  %503 = vmatprep.mubr.msk.bf16.mxu1 %vm695_vm0, %v694_v0  ;;  %v533_v3 = vld [vmem:[#allocation2] sm:$0xff]   ;;  %v534_v4 = vld [vmem:[#allocation7 + $0x18] sm:$0xff]   ;;  %vm113_vm1 = vcmask 261120   ;;  %v535_v5 = vld [vmem:[#allocation7 + $0x10] sm:$0xff]   ;;  %vm200_vm2 = vcmask 523264   ;;  %v696_v34 = vmov 0  }
  0x34   :  { %500 = vmatpush3.bf16.msra.mxu1 %v531_v1  ;;  %v536_v6 = vld [vmem:[#allocation7 + $0x8] sm:$0xff]   ;;  %v537_v7 = vld [vmem:[#allocation7] sm:$0xff]   ;;  %v538_v8 = vld [vmem:[#allocation8 + $0x74] ss:$8 sps:$4 sm:$0xff]   ;;  %388 = vmatprep.mubr.bf16.mxu0 %v696_v34  ;;  %v267_v46 = vshrl.u32 %v266_v45, 7 }
  0x35   :  { %501 = vmatprep.subr.bf16.mxu1 %v694_v0  ;;  %v540_v9 = vld [vmem:[#allocation8 + $0x70] ss:$8 sps:$4 sm:$0xff]   ;;  %v541_v10 = vld [vmem:[#allocation8 + $0x64] ss:$8 sps:$4 sm:$0xff]   ;;  %356 = vmatprep.subr.bf16.mxu0 %v538_v8  ;;  %v543_v11 = vld [vmem:[#allocation8 + $0x60] ss:$8 sps:$4 sm:$0xff]  }
  0x36   :  { %357 = vmatpush1.bf16.msra.mxu0 %v540_v9  ;;  %v544_v12 = vld [vmem:[#allocation8 + $0x54] ss:$8 sps:$4 sm:$0xff]   ;;  %v546_v13 = vld [vmem:[#allocation8 + $0x50] ss:$8 sps:$4 sm:$0xff]   ;;  %v547_v14 = vld [vmem:[#allocation8 + $0x44] ss:$8 sps:$4 sm:$0xff]  }
  0x37   :  { %358 = vmatprep.subr.bf16.mxu0 %v541_v10  ;;  %v549_v15 = vld [vmem:[#allocation8 + $0x40] ss:$8 sps:$4 sm:$0xff]   ;;  %v550_v16 = vld [vmem:[#allocation8 + $0x34] ss:$8 sps:$4 sm:$0xff]   ;;  %v552_v17 = vld [vmem:[#allocation8 + $0x30] ss:$8 sps:$4 sm:$0xff]  }
  0x38   :  { %502 = vmatpush3.bf16.msra.mxu1 %v532_v2  ;;  %v553_v18 = vld [vmem:[#allocation8 + $0x24] ss:$8 sps:$4 sm:$0xff]   ;;  %v456_v19 = vld [vmem:[%s770_s2] ss:$0 sm:$0xff]  ;;  %v556_v30 = vld [vmem:[#allocation8 + $0x14] ss:$8 sps:$4 sm:$0xff]  }
  0x39   :  { %507 = vmatprep.subr.bf16.mxu1 %v694_v0  ;;  %v555_v29 = vld [vmem:[#allocation8 + $0x20] ss:$8 sps:$4 sm:$0xff]   ;;  %v558_v31 = vld [vmem:[#allocation8 + $0x10] ss:$8 sps:$4 sm:$0xff]   ;;  %v559_v32 = vld [vmem:[#allocation8 + $0x4] ss:$8 sps:$4 sm:$0xff]  }
  0x3a   :  { %359 = vmatpush1.bf16.msra.mxu0 %v543_v11  ;;  %v561_v33 = vld [vmem:[#allocation8] ss:$8 sps:$4 sm:$0xff]   ;;  %v268_v47 = vsub.s32 0, %v267_v46  ;;  %v272_v49 = vsub.s32 1, %v267_v46 }
  0x3b   :  { %504 = vmatmul.mubr.msk.bf16.vlgmr.msra.gmra.mxu1 %vm113_vm1, %v533_v3  ;;  %360 = vmatprep.subr.bf16.mxu0 %v544_v12  ;;  %v461_v35 = vld [vmem:[%s772_s4] ss:$0 sm:$0xff]  ;;  %s697_s4 = smov [#allocation10]  }
  0x3c   :  { %508 = vmatpush3.bf16.msra.mxu1 %v534_v4  ;;  %515 = vmatprep.mubr.msk.bf16.mxu1 %vm695_vm0, %v694_v0  ;;  %v264_v48 = vld [vmem:[%s774_s6] sm:$0x3]  ;;  %s442_s6 = sshll.u32 %s697_s4, 4  ;;  %s443_s6 = int_to_ptr.vmem [resolvable:$true] %s442_s6 }
  0x3d   :  { %509 = vmatprep.subr.bf16.mxu1 %v694_v0  ;;  %v269_v50 = vrot.slane %v264_v48, %v268_v47  ;;  %v273_v51 = vrot.slane %v264_v48, %v272_v49  ;;  %s658_s26 = scalar_lea.vmem %s443_s6, 256  ;;  %p663_p7 = scmp.lt.s32.totalorder %s443_s6, %s443_s6 }
  0x3e   :  { %361 = vmatpush1.bf16.msra.mxu0 %v546_v13  ;;  %p659_p6 = scmp.ne.s32.totalorder %s443_s6, %s658_s26  ;;  %p664_p8 = scmp.lt.s32.totalorder %s658_s26, %s658_s26 }
  0x3f   :  { %362 = vmatprep.subr.bf16.mxu0 %v547_v14 }
  0x40   :  { %510 = vmatpush3.bf16.msra.mxu1 %v535_v5  ;;  %p665_p9 = por %p664_p8, %p663_p7 }
  0x41   :  { %511 = vmatprep.subr.bf16.mxu1 %v694_v0 }
  0x42   :  { %363 = vmatpush1.bf16.msra.mxu0 %v549_v15  ;;  %p666_p10 = pnand %p665_p9, %p659_p6 }
  0x43   :  { %364 = vmatprep.subr.bf16.mxu0 %v550_v16 }
  0x44   :  { %512 = vmatpush3.bf16.msra.mxu1 %v536_v6 }
  0x45   :  { %513 = vmatprep.subr.bf16.mxu1 %v694_v0 }
  0x46   :  { %365 = vmatpush1.bf16.msra.mxu0 %v552_v17 }
  0x47   :  { %366 = vmatprep.subr.bf16.mxu0 %v553_v18 }
  0x48   :  { %514 = vmatpush3.bf16.msra.mxu1 %v537_v7 }
  0x4a   :  { %367 = vmatpush1.bf16.msra.mxu0 %v555_v29 }
  0x4b   :  { %368 = vmatprep.subr.bf16.mxu0 %v556_v30 }
  0x4e   :  { %369 = vmatpush1.bf16.msra.mxu0 %v558_v31 }
  0x4f   :  { %370 = vmatprep.subr.bf16.mxu0 %v559_v32 }
  0x52   :  { %371 = vmatpush1.bf16.msra.mxu0 %v561_v33 }
  0xfb   :  { %v151_v20 = vpop.f32.mrf.mxu1 }
  0xfc   :  { %v152_v22 = vadd.f32 %v456_v19, %v151_v20 }
  0xfd   :  { %v505_v21 = vpop.f32.mrf.mxu1 }
  0xfe   :  { %v158_v26 = vmax.f32 %v152_v22, 0.0 }
  0xff   :  { %v154_v23 = vpop.f32.mrf.mxu1 }
 0x100   :  { %v155_v24 = vadd.f32 %v456_v19, %v154_v23 }
 0x101   :  { %v506_v25 = vpop.f32.mrf.mxu1 }
 0x102   :  { %v159_v27 = vmax.f32 %v155_v24, 0.0 }
 0x104   :  { %v160_v28 = vpack.c.bf16 %v159_v27, %v158_v26 }
 0x106   :  { %516 = vmatmul.mubr.msk.bf16.vlgmr.msra.gmra.mxu1 %vm200_vm2, %v160_v28 }
 0x1c6   :  { %v238_v36 = vpop.f32.mrf.mxu1 }
 0x1c7   :  { %v239_v38 = vadd.f32 %v461_v35, %v238_v36 }
 0x1c8   :  { %v517_v37 = vpop.f32.mrf.mxu1 }
 0x1c9   :  { %v245_v42 = vmax.f32 %v239_v38, 0.0 }
 0x1ca   :  { %v241_v39 = vpop.f32.mrf.mxu1 }
 0x1cb   :  { %v242_v40 = vadd.f32 %v461_v35, %v241_v39 }
 0x1cc   :  { %v518_v41 = vpop.f32.mrf.mxu1 }
 0x1cd   :  { %v246_v43 = vmax.f32 %v242_v40, 0.0 }
 0x1cf   :  { %v247_v44 = vpack.c.bf16 %v246_v43, %v245_v42 }
 0x1d1   :  { %389 = vmatmul.mubr.bf16.vlgmr.msra.gmra.mxu0 %v247_v44 }
 0x291   :  { %v390_v52 = vpop.f32.mrf.mxu0 }
 0x292   :  { %v391_v53 = vadd.f32 %v390_v52, %v269_v50 }
 0x293   :  { %v392_v54 = vpop.f32.mrf.mxu0 }
 0x294   :  { %v483_v55 = vmul.f32 -1.442695, %v391_v53  ;;  %v393_v56 = vadd.f32 %v392_v54, %v273_v51 }
 0x295   :  { %v394_v57 = vpop.f32.mrf.mxu0 }
 0x296   :  { %562 = vpow2.f32 %v483_v55  ;;  %v484_v58 = vmul.f32 -1.442695, %v393_v56  ;;  %v395_v59 = vadd.f32 %v394_v57, %v269_v50 }
 0x297   :  { %v396_v60 = vpop.f32.mrf.mxu0 }
 0x298   :  { %564 = vpow2.f32 %v484_v58  ;;  %v485_v61 = vmul.f32 -1.442695, %v395_v59  ;;  %v397_v62 = vadd.f32 %v396_v60, %v273_v51 }
 0x29a   :  { %566 = vpow2.f32 %v485_v61  ;;  %v486_v63 = vmul.f32 -1.442695, %v397_v62 }
 0x29c   :  { %568 = vpow2.f32 %v486_v63 }
 0x2a3   :  { %v563_v0 = vpop.eup %562 }
 0x2a4   :  { %v411_v1 = vadd.f32 1.0, %v563_v0 }
 0x2a5   :  { %v565_v2 = vpop.eup %564 }
 0x2a6   :  { %v412_v3 = vadd.f32 1.0, %v565_v2  ;;  %570 = vrcp.f32 %v411_v1 }
 0x2a7   :  { %v567_v4 = vpop.eup %566 }
 0x2a8   :  { %572 = vrcp.f32 %v412_v3  ;;  %v413_v5 = vadd.f32 1.0, %v567_v4 }
 0x2a9   :  { %v569_v6 = vpop.eup %568 }
 0x2aa   :  { %v414_v7 = vadd.f32 1.0, %v569_v6  ;;  %574 = vrcp.f32 %v413_v5 }
 0x2ac   :  { %576 = vrcp.f32 %v414_v7 }
 0x2b3   :  { %v571_v8 = vpop.eup %570 }
 0x2b5   :  { %v573_v9 = vpop.eup %572 }
 0x2b6   :  { %v489_v10 = vpack.c.bf16 %v573_v9, %v571_v8 }
 0x2b7   :  { %v575_v11 = vpop.eup %574 }
 0x2b8   :  { %435 = vst [vmem:[#allocation10] sm:$0xff] %v489_v10 }
 0x2b9   :  { %v577_v12 = vpop.eup %576 }
 0x2ba   :  { %v490_v13 = vpack.c.bf16 %v577_v12, %v575_v11 }
 0x2bc   :  { %436 = vst [vmem:[#allocation10 + $0x8] sm:$0xff] %v490_v13 }
 0x2bd   :  { %669 = shalt.err (!%p666_p10)
}
 0x2be   :  { %448 = dma.vmem_to_hbm [thread:$0]  %s443_s6, 256, %s775_s7, [#allocation4], %s692_s0, %s692_s0, %s693_s20  }
 0x2bf   :  { %684 = dma.done.wait [#allocation4], 256  }
 0x2c0   :  { %685 = vsyncadd [#allocation4], 4294967040 }
 0x2c1   :  { %452 = vsyncpa [#allocation3], 1 }
 0x2c2   :  { %453 = vsyncpa [#allocation6], 1 }
 0x2c3   :  { %454 = vsyncpa [#allocation9], 1 }
 0x2c4   :  { %455 = vsyncpa [#allocation4], 1 }

</bundles_post_ra>
